<compile_context>
chip_gen: v6e
topology: v6e:2x2x1
jax: 0.10.0
libtpu: 0.0.40
codegen_flags: <defaults>
</compile_context>

<pallas_src>
import jax
import jax.numpy as jnp
from jax.experimental import pallas as pl
from jax.experimental.pallas import tpu as pltpu

_BN_EPS = 1e-5                 # nn.BatchNorm1d default eps
_NORM_EPS = 1e-12              # F.normalize default eps
_NORM_EPS_SQ = _NORM_EPS * _NORM_EPS

# VMEM budgets (bytes) for double-buffered blocks of the gram kernel.
_IN_BUDGET = 16 << 20          # 2 * B_blk * C * hw_tile * 4
_VAL_BUDGET = 24 << 20         # 2 * B_blk * C * C * 4


# ---------------------------------------------------------------------------
# Kernel 1 (per teacher layer): gram over HW + F.normalize(dim=-1) + row mean.
# Grid: (batch-block [parallel], hw-chunk [arbitrary, accumulated in val_ref]).
# ---------------------------------------------------------------------------
def _gram_norm_mean_kernel(x_ref, val_ref, cm_ref):
    # x_ref:   (B_blk, C, hw_tile)  input chunk
    # val_ref: (B_blk, C, C) f32    gram accumulator / normalized gram output
    #                               (block-resident across the hw axis)
    # cm_ref:  (B_blk, 1, C) f32    per-channel mean of the normalized gram
    k = pl.program_id(1)
    b_blk, c, _ = x_ref.shape

    @pl.when(k == 0)
    def _init():
        val_ref[...] = jnp.zeros_like(val_ref)

    f = x_ref[...]                                           # (B_blk, C, hw_tile)
    # Batched gram partial sum over this spatial chunk: 'bik,bjk->bij'.
    val_ref[...] += jax.lax.dot_general(
        f, f, (((2,), (2,)), ((0,), (0,))),
        preferred_element_type=jnp.float32)

    @pl.when(k == pl.num_programs(1) - 1)
    def _finalize():
        g = val_ref[...]                                     # (B_blk, C, C)
        # F.normalize(g, dim=-1) == g / max(||row||, 1e-12); rsqrt of the
        # clamped sum-of-squares uses the EUP slot instead of a VALU divide.
        inv = jax.lax.rsqrt(
            jnp.maximum(jnp.sum(g * g, axis=2, keepdims=True), _NORM_EPS_SQ))
        gn = g * inv
        val_ref[...] = gn
        # Row means emitted lane-dense as (B_blk, 1, C) via a ones-row matmul:
        #   (ones(1,C) . gn^T)[b, 0, i] = sum_j gn[b, i, j]
        ones_row = jnp.ones((b_blk, 1, c), jnp.float32)
        row_sum = jax.lax.dot_general(
            ones_row, gn, (((2,), (2,)), ((0,), (0,))),
            preferred_element_type=jnp.float32)              # (B_blk, 1, C)
        cm_ref[...] = row_sum * (1.0 / c)


def _pick_b_blk(bs, c):
    """Largest divisor of bs (<= 8) whose gram blocks fit the VMEM budget."""
    best = 1
    for d in range(1, min(bs, 8) + 1):
        if bs % d == 0 and 2 * d * c * c * 4 <= _VAL_BUDGET:
            best = d
    return best


def _plan_hw(hw, b_blk, c):
    """Spatial chunking: (hw_tile, padded_hw, n_chunks), hw_tile 128-aligned
    (or == hw for a single full block), sized from the VMEM input budget."""
    per_col = 2 * b_blk * c * 4            # bytes per hw column, double-buffered
    max_tile = max(_IN_BUDGET // per_col, 128)
    if hw <= max_tile:
        return hw, hw, 1
    max_tile = (max_tile // 128) * 128
    n_k = -(-hw // max_tile)               # ceil
    tile = -(-hw // n_k)
    tile = ((tile + 127) // 128) * 128     # lane-legal chunk
    return tile, tile * n_k, n_k


def gram_norm_mean(f):
    """f: (bs, C, HW) f32 -> (value (bs, C, C), cm (bs, 1, C))."""
    bs, c, hw = f.shape
    b_blk = _pick_b_blk(bs, c)
    hw_tile, hw_pad, n_k = _plan_hw(hw, b_blk, c)
    if hw_pad != hw:
        # zero columns are gram-inert; keeps chunks 128-aligned + pipelined
        f = jnp.pad(f, ((0, 0), (0, 0), (0, hw_pad - hw)))

    itemsize = 4
    vmem_bytes = (2 * b_blk * c * hw_tile      # input blocks (double-buffered)
                  + 2 * b_blk * c * c          # value output blocks
                  + 2 * b_blk * c) * itemsize  # cm output blocks
    vmem_bytes = int(max(vmem_bytes + (2 << 20), 4 << 20))   # + headroom

    return pl.pallas_call(
        _gram_norm_mean_kernel,
        out_shape=(jax.ShapeDtypeStruct((bs, c, c), jnp.float32),
                   jax.ShapeDtypeStruct((bs, 1, c), jnp.float32)),
        grid=(bs // b_blk, n_k),
        in_specs=[pl.BlockSpec((b_blk, c, hw_tile), lambda b, k: (b, 0, k))],
        out_specs=(pl.BlockSpec((b_blk, c, c), lambda b, k: (b, 0, 0)),
                   pl.BlockSpec((b_blk, 1, c), lambda b, k: (b, 0, 0))),
        compiler_params=pltpu.CompilerParams(
            dimension_semantics=("parallel", "arbitrary"),
            vmem_limit_bytes=vmem_bytes),
    )(f)


# ---------------------------------------------------------------------------
# Kernel 2 (ALL teacher layers in one gridless call):
# block-diagonal Linear + per-feature BatchNorm1d (relu=False, batch stats).
# ---------------------------------------------------------------------------
def _query_kernel(cm_ref, w_ref, b_ref, gamma_ref, beta_ref, o_ref):
    # cm_ref: (bs, sum_C)   w_ref: (sum_C, n_t*qk)  b/gamma/beta: (1, n_t*qk)
    # o_ref:  (bs, n_t*qk)
    z = jnp.dot(cm_ref[...], w_ref[...],
                preferred_element_type=jnp.float32) + b_ref[...]
    # BatchNorm1d training mode (biased batch statistics).
    mean = jnp.mean(z, axis=0, keepdims=True)
    var = jnp.mean(jnp.square(z - mean), axis=0, keepdims=True)
    o_ref[...] = ((z - mean) * jax.lax.rsqrt(var + _BN_EPS)
                  * gamma_ref[...] + beta_ref[...]).astype(o_ref.dtype)


def query_heads(cm_flat, w_bd, b_flat, gamma_flat, beta_flat):
    bs = cm_flat.shape[0]
    nq = w_bd.shape[1]
    return pl.pallas_call(
        _query_kernel,
        out_shape=jax.ShapeDtypeStruct((bs, nq), jnp.float32),
    )(cm_flat, w_bd, b_flat, gamma_flat, beta_flat)


# ---------------------------------------------------------------------------
# Module wrapper (parameter setup + minimal glue in plain JAX).
# ---------------------------------------------------------------------------
class LinearTransformTeacherPallas:
    """Pallas forward of LinearTransformTeacher (AFD).

    query_layer[t] = Linear(C_t, qk_dim) + BatchNorm1d(qk_dim), relu=False path,
    BN in training mode (biased batch statistics), as in the reference default.
    """
    # TODO(synk): BatchNorm1d running_mean/running_var side-effect updates are
    # not emitted; only the forward outputs are produced.

    def __init__(self, t_shapes, qk_dim, rng):
        self.t_shapes = [tuple(s) for s in t_shapes]
        self.qk_dim = qk_dim
        self.n_t = len(self.t_shapes)
        cs = [s[1] for s in self.t_shapes]

        keys = iter(jax.random.split(rng, 3 * self.n_t))
        w_list, b_list, gamma_list, beta_list = [], [], [], []
        for c in cs:
            bound = 1.0 / float(c) ** 0.5            # nn.Linear default init range
            w_list.append(jax.random.uniform(next(keys), (c, qk_dim),
                                             jnp.float32, -bound, bound))
            b_list.append(jax.random.uniform(next(keys), (qk_dim,),
                                             jnp.float32, -bound, bound))
            gamma_list.append(1.0 + 0.1 * jax.random.normal(next(keys), (qk_dim,),
                                                            jnp.float32))
            beta_list.append(jnp.zeros((qk_dim,), jnp.float32))

        # per-layer params kept for the pure-JAX reference
        self.w_list, self.b_list = w_list, b_list
        self.gamma_list, self.beta_list = gamma_list, beta_list

        # fused params for the single query kernel: block-diagonal Linear over
        # the concatenated (unpadded) per-layer channel means.
        self.w_bd = jax.scipy.linalg.block_diag(*w_list)       # (sum C_t, n_t*qk)
        self.b_flat = jnp.concatenate(b_list)[None, :]          # (1, n_t*qk)
        self.gamma_flat = jnp.concatenate(gamma_list)[None, :]
        self.beta_flat = jnp.concatenate(beta_list)[None, :]

    def __call__(self, g_t):
        bs = g_t[0].shape[0]
        value, cms = [], []
        for x in g_t:
            c = x.shape[1]
            # NCHW -> (bs, C, HW) is a contiguous view; the gram contracts over
            # HW (already the trailing lane axis), so no transpose is needed.
            f = x.reshape(bs, c, -1)
            v, cm = gram_norm_mean(f)
            value.append(v)                          # (bs, C, C)
            cms.append(cm)                           # (bs, 1, C)
        # One concat + free reshapes; no per-layer pad/stack/transpose glue.
        cm_flat = jnp.concatenate(cms, axis=-1).reshape(bs, -1)     # (bs, sum C_t)
        q_flat = query_heads(cm_flat, self.w_bd, self.b_flat,
                             self.gamma_flat, self.beta_flat)       # (bs, n_t*qk)
        query = q_flat.reshape(bs, self.n_t, self.qk_dim)           # free view
        return query, value


# ---------------------------------------------------------------------------
# Pure-JAX reference (mirrors the PyTorch forward) for a correctness check.
# ---------------------------------------------------------------------------
def _reference_forward(model, g_t):
    bs = g_t[0].shape[0]
    value_ref, cms = [], []
    for x in g_t:
        c = x.shape[1]
        f = x.reshape(bs, c, -1)
        g = jnp.einsum('bik,bjk->bij', f, f,
                       precision=jax.lax.Precision.HIGHEST)
        norm = jnp.maximum(jnp.sqrt(jnp.sum(g * g, axis=2, keepdims=True)),
                           _NORM_EPS)
        gn = g / norm
        value_ref.append(gn)
        cms.append(gn.mean(axis=2))
    queries = []
    for t, cm in enumerate(cms):
        z = cm @ model.w_list[t] + model.b_list[t]
        mean = z.mean(axis=0, keepdims=True)
        var = jnp.mean(jnp.square(z - mean), axis=0, keepdims=True)
        zn = (z - mean) / jnp.sqrt(var + _BN_EPS)
        queries.append(zn * model.gamma_list[t] + model.beta_list[t])
    return jnp.stack(queries, axis=1), value_ref


if __name__ == "__main__":
    rng = jax.random.PRNGKey(0)
    # small synthetic teacher shapes (NCHW), consistent with the module
    t_shapes = [(2, 8, 16, 16), (2, 16, 8, 8), (2, 32, 4, 4)]
    qk_dim = 32

    rng, pkey = jax.random.split(rng)
    model = LinearTransformTeacherPallas(t_shapes, qk_dim, pkey)

    in_keys = jax.random.split(rng, len(t_shapes))
    g_t = [jax.random.normal(k, s, jnp.float32) for k, s in zip(in_keys, t_shapes)]

    query, value = model(g_t)
    jax.block_until_ready(query)
    for v in value:
        jax.block_until_ready(v)

    # shape checks
    assert query.shape == (2, len(t_shapes), qk_dim)
    for v, s in zip(value, t_shapes):
        assert v.shape == (s[0], s[1], s[1])

    # numerical check against the pure-JAX reference
    query_ref, value_ref = _reference_forward(model, g_t)
    assert jnp.allclose(query, query_ref, rtol=2e-3, atol=2e-3), "query mismatch"
    for v, vr in zip(value, value_ref):
        assert jnp.allclose(v, vr, rtol=2e-3, atol=2e-3), "value mismatch"

    print("KERNEL_OK")
</pallas_src>

<mosaic_0001>
module attributes {stable_mosaic.version = 11 : i64} {
  func.func @_gram_norm_mean_kernel(%arg0: i32, %arg1: i32, %arg2: memref<2x8x256xf32, #tpu.memory_space<vmem>>, %arg3: memref<2x8x8xf32, #tpu.memory_space<vmem>>, %arg4: memref<2x1x8xf32, #tpu.memory_space<vmem>>) attributes {dimension_semantics = [#tpu.dimension_semantics<parallel>, #tpu.dimension_semantics<arbitrary>], iteration_bounds = array<i64: 1, 1>, scalar_prefetch = 0 : i64, scratch_operands = 0 : i64, tpu.core_type = #tpu.core_type<tc>, window_params = [{transform_indices = @transform_0, window_bounds = array<i64: 2, 8, 256>}, {transform_indices = @transform_1, window_bounds = array<i64: 2, 8, 8>}, {transform_indices = @transform_2, window_bounds = array<i64: 2, 1, 8>}]} {
    %c0_i32 = arith.constant 0 : i32
    %0 = arith.cmpi eq, %arg1, %c0_i32 : i32
    %1 = arith.extui %0 : i1 to i32
    %c0_i32_0 = arith.constant 0 : i32
    %2 = arith.cmpi ne, %1, %c0_i32_0 : i32
    scf.if %2 {
      %cst_11 = arith.constant 0.000000e+00 : f32
      %11 = vector.broadcast %cst_11 : f32 to vector<2x8x8xf32>
      %c0_12 = arith.constant 0 : index
      %c0_13 = arith.constant 0 : index
      %c0_14 = arith.constant 0 : index
      %12 = vector.load %arg3[%c0_12, %c0_13, %c0_14] : memref<2x8x8xf32, #tpu.memory_space<vmem>>, vector<2x8x8xf32>
      tpu.vector_store %arg3[%c0_12, %c0_13, %c0_14], %11 {strides = array<i32>} : memref<2x8x8xf32, #tpu.memory_space<vmem>>, vector<2x8x8xf32>,
    } else {
    }
    %c0 = arith.constant 0 : index
    %c0_1 = arith.constant 0 : index
    %c0_2 = arith.constant 0 : index
    %3 = vector.load %arg2[%c0, %c0_1, %c0_2] : memref<2x8x256xf32, #tpu.memory_space<vmem>>, vector<2x8x256xf32>
    %c0_3 = arith.constant 0 : index
    %c0_4 = arith.constant 0 : index
    %c0_5 = arith.constant 0 : index
    %4 = vector.load %arg3[%c0_3, %c0_4, %c0_5] : memref<2x8x8xf32, #tpu.memory_space<vmem>>, vector<2x8x8xf32>
    %cst = arith.constant dense<0.000000e+00> : vector<2x8x8xf32>
    %5 = tpu.matmul %3, %3, %cst {dimension_numbers = #tpu.dot_dimension_numbers<[2], [2], [1], [1], [0, 0, 0, 1, 1, 1], [0], [0]>} : vector<2x8x256xf32>, vector<2x8x256xf32>, vector<2x8x8xf32> -> vector<2x8x8xf32>
    %6 = arith.addf %4, %5 : vector<2x8x8xf32>
    %c0_6 = arith.constant 0 : index
    %c0_7 = arith.constant 0 : index
    %c0_8 = arith.constant 0 : index
    %7 = vector.load %arg3[%c0_6, %c0_7, %c0_8] : memref<2x8x8xf32, #tpu.memory_space<vmem>>, vector<2x8x8xf32>
    tpu.vector_store %arg3[%c0_6, %c0_7, %c0_8], %6 {strides = array<i32>} : memref<2x8x8xf32, #tpu.memory_space<vmem>>, vector<2x8x8xf32>,
    %c0_i32_9 = arith.constant 0 : i32
    %8 = arith.cmpi eq, %arg1, %c0_i32_9 : i32
    %9 = arith.extui %8 : i1 to i32
    %c0_i32_10 = arith.constant 0 : i32
    %10 = arith.cmpi ne, %9, %c0_i32_10 : i32
    scf.if %10 {
      %c0_11 = arith.constant 0 : index
      %c0_12 = arith.constant 0 : index
      %c0_13 = arith.constant 0 : index
      %11 = vector.load %arg3[%c0_11, %c0_12, %c0_13] : memref<2x8x8xf32, #tpu.memory_space<vmem>>, vector<2x8x8xf32>
      %12 = arith.mulf %11, %11 : vector<2x8x8xf32>
      %cst_14 = arith.constant dense<0.000000e+00> : vector<2x8xf32>
      %13 = vector.multi_reduction <add>, %12, %cst_14 [2] : vector<2x8x8xf32> to vector<2x8xf32>
      %14 = vector.shape_cast %13 : vector<2x8xf32> to vector<2x8x1xf32>
      %cst_15 = arith.constant 1.000000e-24 : f32
      %15 = vector.broadcast %cst_15 : f32 to vector<2x8x1xf32>
      %16 = arith.maximumf %14, %15 : vector<2x8x1xf32>
      %17 = math.rsqrt %16 : vector<2x8x1xf32>
      %18 = vector.broadcast %17 : vector<2x8x1xf32> to vector<2x8x8xf32>
      %19 = arith.mulf %11, %18 : vector<2x8x8xf32>
      %c0_16 = arith.constant 0 : index
      %c0_17 = arith.constant 0 : index
      %c0_18 = arith.constant 0 : index
      %20 = vector.load %arg3[%c0_16, %c0_17, %c0_18] : memref<2x8x8xf32, #tpu.memory_space<vmem>>, vector<2x8x8xf32>
      tpu.vector_store %arg3[%c0_16, %c0_17, %c0_18], %19 {strides = array<i32>} : memref<2x8x8xf32, #tpu.memory_space<vmem>>, vector<2x8x8xf32>,
      %cst_19 = arith.constant 1.000000e+00 : f32
      %21 = vector.broadcast %cst_19 : f32 to vector<2x1x8xf32>
      %cst_20 = arith.constant dense<0.000000e+00> : vector<2x1x8xf32>
      %22 = tpu.matmul %21, %19, %cst_20 {dimension_numbers = #tpu.dot_dimension_numbers<[2], [2], [1], [1], [0, 0, 0, 1, 1, 1], [0], [0]>} : vector<2x1x8xf32>, vector<2x8x8xf32>, vector<2x1x8xf32> -> vector<2x1x8xf32>
      %cst_21 = arith.constant 1.250000e-01 : f32
      %23 = vector.broadcast %cst_21 : f32 to vector<2x1x8xf32>
      %24 = arith.mulf %22, %23 : vector<2x1x8xf32>
      %c0_22 = arith.constant 0 : index
      %c0_23 = arith.constant 0 : index
      %c0_24 = arith.constant 0 : index
      %25 = vector.load %arg4[%c0_22, %c0_23, %c0_24] : memref<2x1x8xf32, #tpu.memory_space<vmem>>, vector<2x1x8xf32>
      tpu.vector_store %arg4[%c0_22, %c0_23, %c0_24], %24 {strides = array<i32>} : memref<2x1x8xf32, #tpu.memory_space<vmem>>, vector<2x1x8xf32>,
    } else {
    }
    return
  }
  func.func @transform_0(%arg0: i32, %arg1: i32) -> (i32, i32, i32) {
    %c0_i32 = arith.constant 0 : i32
    %c0_i32_0 = arith.constant 0 : i32
    return %arg0, %c0_i32, %arg1 : i32, i32, i32
  }
  func.func @transform_1(%arg0: i32, %arg1: i32) -> (i32, i32, i32) {
    %c0_i32 = arith.constant 0 : i32
    %c0_i32_0 = arith.constant 0 : i32
    %c0_i32_1 = arith.constant 0 : i32
    return %arg0, %c0_i32, %c0_i32_0 : i32, i32, i32
  }
  func.func @transform_2(%arg0: i32, %arg1: i32) -> (i32, i32, i32) {
    %c0_i32 = arith.constant 0 : i32
    %c0_i32_0 = arith.constant 0 : i32
    %c0_i32_1 = arith.constant 0 : i32
    return %arg0, %c0_i32, %c0_i32_0 : i32, i32, i32
  }
}

</mosaic_0001>

<bundles_post_ra>
// kernel: tpu_custom_call.1
= control target key start
LH: loop header
LB: loop body
LE: loop exit
PB: predicated region body
PF: predicated region fallthrough
CT: control target
= control target key end

     0   :  { %8 = vsyncpa [#allocation3], 0  ;;  %s541_s0 = inlined_call_operand.hbm [shape: f32[2,8,256], index: 0, kind: input, shape index: {}]   ;;  %s542_s1 = inlined_call_operand.hbm [shape: f32[2,8,8], index: 1, kind: output, shape index: {0}]   ;;  %s543_s2 = inlined_call_operand.hbm [shape: f32[2,1,8], index: 2, kind: output, shape index: {1}]  }
   0x1   :  { %9 = vsyncpa [#allocation4], 0 }
   0x2   :  { %10 = vsyncpa [#allocation7], 0  ;;  %s491_s9 = smov [#allocation2]  }
   0x3   :  { %s16_s10 = sshll.u32 %s491_s9, 4  ;;  %s17_s10 = int_to_ptr.vmem [resolvable:$true] %s16_s10 }
   0x4   :  { %s433_s11 = scalar_lea.vmem %s17_s10, 512  ;;  %p438_p1 = scmp.lt.s32.totalorder %s17_s10, %s17_s10 }
   0x5   :  { %p434_p0 = scmp.ne.s32.totalorder %s17_s10, %s433_s11  ;;  %p439_p2 = scmp.lt.s32.totalorder %s433_s11, %s433_s11 }
   0x7   :  { %p440_p3 = por %p439_p2, %p438_p1 }
   0x9   :  { %p441_p4 = pnand %p440_p3, %p434_p0 }
   0xb   :  { %444 = shalt.err (!%p441_p4)
}
   0xc   :  { %s492_s12 = smov 256   ;;  %s493_s13 = smov 16  }
   0xd   :  { %22 = dma.hbm_to_vmem [thread:$0]  %s541_s0, 512, %s17_s10, [#allocation3], %s492_s12, %s492_s12, %s493_s13  }
   0xe   :  { %485 = dma.done.wait [#allocation3], 512  }
   0xf   :  { %486 = vsyncadd [#allocation3], 4294966784  ;;  %vm30_vm0 = vcmask 64512   ;;  %v494_v0 = vmov 0.0   ;;  %v34_v1 = vld [vmem:[#allocation2 + $0x8] sm:$0xff]  ;;  %v33_v2 = vld [vmem:[#allocation2] sm:$0xff] }
  0x10   :  { %31 = vst.msk [vmem:[#allocation5] sm:$0xff] %vm30_vm0, %v494_v0  ;;  %32 = vst.msk [vmem:[#allocation5 + $0x8] sm:$0xff] %vm30_vm0, %v494_v0  ;;  %v36_v3 = vld [vmem:[#allocation2 + $0x18] sm:$0xff]  ;;  %69 = vmatprep.subr.mxu0 %v34_v1  ;;  %v35_v4 = vld [vmem:[#allocation2 + $0x10] sm:$0xff]  ;;  %103 = vmatprep.mubr.f32.mxu0 %v34_v1  ;;  %vm495_vm1 = vmmov 0   ;;  %v496_v27 = vmov 1.0  }
  0x11   :  { %139 = vmatprep.subr.mxu1 %v36_v3  ;;  %70 = vmatpush1.xpose.msra.mxu0 %v33_v2  ;;  %s497_s0 = smov [#allocation5]  }
  0x12   :  { %140 = vmatpush1.xpose.msra.mxu1 %v35_v4  ;;  %173 = vmatprep.mubr.f32.mxu1 %v36_v3  ;;  %s364_s16 = sshll.u32 %s497_s0, 4  ;;  %s365_s16 = int_to_ptr.vmem [resolvable:$true] %s364_s16 }
  0x13   :  { %400 = vmatprep.subr.mxu0 %v494_v0  ;;  %405 = vmatprep.subr.mxu1 %v494_v0  ;;  %s445_s17 = scalar_lea.vmem %s365_s16, 256  ;;  %p450_p6 = scmp.lt.s32.totalorder %s365_s16, %s365_s16 }
  0x14   :  { %104 = vmatmul.mubr.f32.vlgmr.msra.gmra.mxu0 %v33_v2  ;;  %p446_p5 = scmp.ne.s32.totalorder %s365_s16, %s445_s17  ;;  %p451_p7 = scmp.lt.s32.totalorder %s445_s17, %s445_s17 }
  0x15   :  { %174 = vmatmul.mubr.f32.vlgmr.msra.gmra.mxu1 %v35_v4  ;;  %402 = vmatprep.mubr.msk.f32.mxu0 %vm495_vm1, %v494_v0 }
  0x16   :  { %407 = vmatprep.mubr.msk.f32.mxu1 %vm495_vm1, %v494_v0  ;;  %p452_p8 = por %p451_p7, %p450_p6 }
  0x17   :  { %v37_v5 = vld [vmem:[#allocation5] sm:$0xff]  ;;  %v38_v6 = vld [vmem:[#allocation5 + $0x8] sm:$0xff] }
  0x18   :  { %p453_p9 = pnand %p452_p8, %p446_p5 }
  0xd4   :  { %v105_v7 = vpop.f32.mrf.mxu0 }
  0xd5   :  { %v179_v8 = vadd.f32 %v105_v7, %v37_v5  ;;  %v175_v9 = vpop.f32.mrf.mxu1 }
  0xd6   :  { %v107_v10 = vpop.f32.mrf.mxu0  ;;  %v180_v11 = vadd.f32 %v175_v9, %v38_v6 }
  0xd7   :  { %182 = vst.msk [vmem:[#allocation5] sm:$0xff] %vm30_vm0, %v179_v8  ;;  %v177_v12 = vpop.f32.mrf.mxu1 }
  0xd8   :  { %183 = vst.msk [vmem:[#allocation5 + $0x8] sm:$0xff] %vm30_vm0, %v180_v11 }
  0xde   :  { %v187_v13 = vld [vmem:[#allocation5] sm:$0xff] }
  0xdf   :  { %v189_v14 = vmul.f32 %v187_v13, %v187_v13  ;;  %v188_v15 = vld [vmem:[#allocation5 + $0x8] sm:$0xff] }
  0xe0   :  { %v190_v16 = vmul.f32 %v188_v15, %v188_v15 }
  0xe1   :  { %v191_v17 = vsel %vm30_vm0, %v189_v14, 0.0 }
  0xe2   :  { %192 = vadd.xlane.f32.xlu0 %v191_v17  ;;  %v194_v18 = vsel %vm30_vm0, %v190_v16, 0.0 }
  0xe6   :  { %195 = vadd.xlane.f32.xlu0 %v194_v18 }
 0x16b   :  { %v193_v19 = vpop.xlane.xlu0 %192 }
 0x16c   :  { %v197_v20 = vmax.f32 %v193_v19, 1e-24 }
 0x16e   :  { %421 = vrsqrt.f32 %v197_v20 }
 0x16f   :  { %v196_v21 = vpop.xlane.xlu0 %195 }
 0x170   :  { %v198_v22 = vmax.f32 %v196_v21, 1e-24 }
 0x172   :  { %423 = vrsqrt.f32 %v198_v22 }
 0x17b   :  { %v422_v23 = vpop.eup %421 }
 0x17c   :  { %v201_v24 = vmul.f32 %v422_v23, %v187_v13 }
 0x17e   :  { %401 = vmatpush3.xpose.msk.msra.mxu0 %vm30_vm0, %v201_v24  ;;  %203 = vst.msk [vmem:[#allocation5] sm:$0xff] %vm30_vm0, %v201_v24 }
 0x17f   :  { %v424_v25 = vpop.eup %423 }
 0x180   :  { %v202_v26 = vmul.f32 %v424_v25, %v188_v15 }
 0x181   :  { %403 = vmatmul.mubr.msk.f32.vlgmr.msra.gmra.mxu0 %vm30_vm0, %v496_v27 }
 0x182   :  { %406 = vmatpush3.xpose.msk.msra.mxu1 %vm30_vm0, %v202_v26  ;;  %204 = vst.msk [vmem:[#allocation5 + $0x8] sm:$0xff] %vm30_vm0, %v202_v26 }
 0x185   :  { %408 = vmatmul.mubr.msk.f32.vlgmr.msra.gmra.mxu1 %vm30_vm0, %v496_v27 }
 0x186   :  { %456 = shalt.err (!%p453_p9)
}
 0x187   :  { %s498_s18 = smov 128   ;;  %s499_s19 = smov 8   ;;  %vm356_vm2 = vcmask 57344  }
 0x188   :  { %370 = dma.vmem_to_hbm [thread:$0]  %s365_s16, 256, %s542_s1, [#allocation4], %s498_s18, %s498_s18, %s499_s19  }
 0x189   :  { %s500_s22 = smov [#allocation6]  }
 0x18a   :  { %s376_s23 = sshll.u32 %s500_s22, 4  ;;  %s377_s23 = int_to_ptr.vmem [resolvable:$true] %s376_s23 }
 0x18b   :  { %s465_s24 = scalar_lea.vmem %s377_s23, 32  ;;  %p470_p11 = scmp.lt.s32.totalorder %s377_s23, %s377_s23 }
 0x18c   :  { %p466_p10 = scmp.ne.s32.totalorder %s377_s23, %s465_s24  ;;  %p471_p12 = scmp.lt.s32.totalorder %s465_s24, %s465_s24 }
 0x18e   :  { %p472_p13 = por %p471_p12, %p470_p11 }
 0x190   :  { %p473_p0 = pnand %p472_p13, %p466_p10 }
 0x241   :  { %v277_v28 = vpop.f32.mrf.mxu0 }
 0x242   :  { %v354_v29 = vmul.f32 0.125, %v277_v28 }
 0x243   :  { %v404_v30 = vpop.f32.mrf.mxu0 }
 0x244   :  { %357 = vst.msk [vmem:[#allocation6] sm:$0x1] %vm356_vm2, %v354_v29 }
 0x245   :  { %v350_v31 = vpop.f32.mrf.mxu1 }
 0x246   :  { %v355_v32 = vmul.f32 0.125, %v350_v31 }
 0x247   :  { %v409_v33 = vpop.f32.mrf.mxu1 }
 0x248   :  { %358 = vst.msk [vmem:[#allocation6 + $0x1] sm:$0x1] %vm356_vm2, %v355_v32 }
 0x249   :  { %476 = shalt.err (!%p473_p0)
}
 0x24a   :  { %s501_s1 = smov 1  }
 0x24b   :  { %382 = dma.vmem_to_hbm [thread:$0]  %s377_s23, 32, %s543_s2, [#allocation7], %s493_s13, %s493_s13, %s501_s1  }
 0x24c   :  { %487 = dma.done.wait [#allocation4], 256  }
 0x24d   :  { %488 = vsyncadd [#allocation4], 4294967040 }
 0x24e   :  { %489 = dma.done.wait [#allocation7], 32  }
 0x24f   :  { %490 = vsyncadd [#allocation7], 4294967264 }
 0x250   :  { %389 = vsyncpa [#allocation3], 1 }
 0x251   :  { %390 = vsyncpa [#allocation4], 1 }
 0x252   :  { %391 = vsyncpa [#allocation7], 1 }

</bundles_post_ra>
